<compile_context>
chip_gen: v7x
topology: tpu7x:2x2x1
jax: 0.10.0
libtpu: 0.0.40
codegen_flags: <defaults>
</compile_context>

<pallas_src>
import jax
import jax.numpy as jnp
from jax.experimental import pallas as pl
from jax.experimental.pallas import tpu as pltpu


# ----------------------------------------------------------------------------
# Kernel: both Q heads of the critic on one row tile of the (implicit) fused
# activation matrix.
# ----------------------------------------------------------------------------
def _critic_fused_kernel(state_ref, y_ref, w1s_ref, w1y_ref, b1_ref,
                         w2_ref, b2_ref, w3_ref, b3_ref, o_ref):
    tb = state_ref.shape[0]          # batch rows in this tile
    rows = y_ref.shape[0]            # tb * N fused rows
    n = rows // tb                   # action samples per batch row (static)
    hp = w2_ref.shape[0]             # padded hidden width (128)
    bf16 = jnp.bfloat16

    # Layer 1 with the concat folded away:
    #   h1 = relu([state | y] @ W1 + b1) = relu(state @ W1s + b1 + y @ W1y)
    # b1 is hoisted onto the (tb, Hp) state projection (per batch row, not per
    # fused row).  Weights are stored bf16; accumulation is f32.
    s_proj = jnp.dot(state_ref[...].astype(bf16), w1s_ref[...],
                     preferred_element_type=jnp.float32) + b1_ref[...]   # (tb, Hp)
    y_proj = jnp.dot(y_ref[...].astype(bf16), w1y_ref[...],
                     preferred_element_type=jnp.float32)                 # (tb*N, Hp)
    # (rows, Hp) <-> (tb, N, Hp) is a free, tile-aligned reinterpretation when
    # N == 8 (f32 sublane count); for other N it is still correct but may
    # insert a relayout copy.
    h1 = jnp.maximum(
        (y_proj.reshape(tb, n, hp) + s_proj[:, None, :]).reshape(rows, hp),
        0.0)

    # Layer 2 (block-diagonal W2 computes both heads in one matmul).
    h2 = jnp.maximum(
        jnp.dot(h1.astype(bf16), w2_ref[...],
                preferred_element_type=jnp.float32) + b2_ref[...],
        0.0)

    # Output layer: lane 0 = q1, lane 1 = q2.
    out = jnp.dot(h2.astype(bf16), w3_ref[...],
                  preferred_element_type=jnp.float32) + b3_ref[...]
    o_ref[...] = out.astype(o_ref.dtype)


# ----------------------------------------------------------------------------
# Wrapper
# ----------------------------------------------------------------------------
def _tpu_generation_kind():
    try:
        return jax.devices()[0].device_kind.lower()
    except Exception:
        return ""


def critic_mlp_forward(state, y, packed_params, *, tb=None, vmem_limit_bytes=None):
    """CriticMLP.forward for 3-D y; both Q heads fused in one pallas_call.

    Returns (q1, q2), each of shape (B*N, 1), matching the PyTorch module.
    """
    B, N, Dy = y.shape
    Ds = state.shape[-1]
    w1s, w1y, b1, w2, b2, w3, b3 = packed_params
    Hp = w2.shape[0]
    O = w3.shape[1]
    assert w1s.shape[0] == Ds and w1y.shape[0] == Dy

    # y as a (B*N, Dy) view -- free reshape, no HBM copy.  The concat with the
    # broadcast state happens inside the kernel (split-W1 matmul).
    y2d = y.reshape(B * N, Dy)

    # Generation-aware tiling / VMEM budget.
    #   v5e/v6e: 128 MiB physical VMEM -> big tiles, 64 MiB scoped limit.
    #   v7x (64 MiB per TC) / unknown: stay conservative; the lane-padded
    #   (rows, 16) inputs and (rows, 2) output each occupy rows*128*4 bytes in
    #   VMEM and are double-buffered.
    kind = _tpu_generation_kind()
    if any(g in kind for g in ("v4", "v5", "v6")):
        rows_target = 8192
        default_vmem = 64 * 1024 * 1024
    else:
        rows_target = 4096
        default_vmem = 40 * 1024 * 1024
    if vmem_limit_bytes is None:
        vmem_limit_bytes = default_vmem

    if tb is None:
        cap = max(8, (rows_target // max(N, 1)) // 8 * 8)
        if B <= 8:
            tb = B                                   # single full tile
        else:
            # At least 2 grid steps so v7x's second TensorCore gets work and
            # the pipeline actually overlaps DMA with compute.
            two_step = (((B + 1) // 2) + 7) // 8 * 8
            tb = max(8, min(cap, two_step))
    grid = (pl.cdiv(B, tb),)
    # If B % tb != 0 the edge tile's padding rows carry unspecified data; the
    # compute is purely row-wise and the output store is masked, so results
    # stay correct (do not add cross-row reductions without revisiting this).

    flops = 2 * B * Ds * Hp + 2 * B * N * (Dy * Hp + Hp * Hp + Hp * O)
    bytes_accessed = (
        state.size * state.dtype.itemsize
        + y.size * y.dtype.itemsize
        + B * N * O * jnp.dtype(state.dtype).itemsize
        + sum(int(p.size) * p.dtype.itemsize for p in packed_params))

    out = pl.pallas_call(
        _critic_fused_kernel,
        out_shape=jax.ShapeDtypeStruct((B * N, O), state.dtype),
        grid=grid,
        in_specs=[
            pl.BlockSpec((tb, Ds), lambda i: (i, 0)),      # state row tile
            pl.BlockSpec((tb * N, Dy), lambda i: (i, 0)),  # y row tile
            # Weights/biases: constant index_map -> same block every grid
            # step, so they stay resident (no per-step re-DMA).
            pl.BlockSpec((Ds, Hp), lambda i: (0, 0)),      # W1 (state part, bf16)
            pl.BlockSpec((Dy, Hp), lambda i: (0, 0)),      # W1 (y part, bf16)
            pl.BlockSpec((1, Hp), lambda i: (0, 0)),       # b1 (f32)
            pl.BlockSpec((Hp, Hp), lambda i: (0, 0)),      # W2 block-diag (bf16)
            pl.BlockSpec((1, Hp), lambda i: (0, 0)),       # b2 (f32)
            pl.BlockSpec((Hp, O), lambda i: (0, 0)),       # W3 two heads (bf16)
            pl.BlockSpec((1, O), lambda i: (0, 0)),        # b3 (f32)
        ],
        out_specs=pl.BlockSpec((tb * N, O), lambda i: (i, 0)),
        compiler_params=pltpu.CompilerParams(
            dimension_semantics=("parallel",),      # shards tiles across TCs
            vmem_limit_bytes=vmem_limit_bytes,
        ),
        cost_estimate=pl.CostEstimate(
            flops=flops, transcendentals=0, bytes_accessed=bytes_accessed),
    )(state, y2d, w1s, w1y, b1, w2, b2, w3, b3)

    return out[:, 0:1], out[:, 1:2]


# ----------------------------------------------------------------------------
# Parameter construction / packing
# ----------------------------------------------------------------------------
def make_q_params(key, in_dim, hidden, out_dim=1, dtype=jnp.float32):
    """One Q MLP's parameters (weights stored as (in, out))."""
    ks = jax.random.split(key, 6)
    s1 = 1.0 / jnp.sqrt(in_dim)
    s2 = 1.0 / jnp.sqrt(hidden)
    w1 = jax.random.uniform(ks[0], (in_dim, hidden), dtype, -s1, s1)
    b1 = jax.random.uniform(ks[1], (1, hidden), dtype, -s1, s1)
    w2 = jax.random.uniform(ks[2], (hidden, hidden), dtype, -s2, s2)
    b2 = jax.random.uniform(ks[3], (1, hidden), dtype, -s2, s2)
    w3 = jax.random.uniform(ks[4], (hidden, out_dim), dtype, -s2, s2)
    b3 = jax.random.uniform(ks[5], (1, out_dim), dtype, -s2, s2)
    return (w1, b1, w2, b2, w3, b3)


def pack_critic_params(q1_params, q2_params, *, ds, hidden_pad=128):
    """Pack both Q heads into one lane-dense parameter set.

    W1 is split into its state rows (Ds, Hp) and y rows (Dy, Hp); q1 occupies
    hidden lanes [0:H), q2 lanes [H:2H), the rest is zero padding.  W2 is
    block-diagonal, W3 maps head 1 -> lane 0 and head 2 -> lane 1.  Weight
    slabs are stored bf16 (MXU-native); biases stay f32 for the elementwise
    path.  Zero padding keeps the numerics of each head exact.
    """
    w1_1, b1_1, w2_1, b2_1, w3_1, b3_1 = q1_params
    w1_2, b1_2, w2_2, b2_2, w3_2, b3_2 = q2_params
    in_dim, h = w1_1.shape
    dy = in_dim - ds
    f32 = jnp.float32
    bf16 = jnp.bfloat16
    hp = hidden_pad
    assert 2 * h <= hp, "both heads must fit in the padded hidden slab"

    w1s = (jnp.zeros((ds, hp), f32)
           .at[:, :h].set(w1_1[:ds]).at[:, h:2 * h].set(w1_2[:ds])).astype(bf16)
    w1y = (jnp.zeros((dy, hp), f32)
           .at[:, :h].set(w1_1[ds:]).at[:, h:2 * h].set(w1_2[ds:])).astype(bf16)
    b1 = jnp.zeros((1, hp), f32).at[:, :h].set(b1_1).at[:, h:2 * h].set(b1_2)
    w2 = (jnp.zeros((hp, hp), f32)
          .at[:h, :h].set(w2_1).at[h:2 * h, h:2 * h].set(w2_2)).astype(bf16)
    b2 = jnp.zeros((1, hp), f32).at[:, :h].set(b2_1).at[:, h:2 * h].set(b2_2)
    w3 = (jnp.zeros((hp, 2), f32)
          .at[:h, 0:1].set(w3_1).at[h:2 * h, 1:2].set(w3_2)).astype(bf16)
    b3 = jnp.concatenate([b3_1, b3_2], axis=-1).astype(f32)   # (1, 2)
    return (w1s, w1y, b1, w2, b2, w3, b3)


def _ref_mlp(x, params):
    w1, b1, w2, b2, w3, b3 = params
    h1 = jnp.maximum(x @ w1 + b1, 0.0)
    h2 = jnp.maximum(h1 @ w2 + b2, 0.0)
    return h2 @ w3 + b3


def _ref_critic(state, y, q1_params, q2_params):
    B, N, Dy = y.shape
    Ds = state.shape[-1]
    fused = jnp.concatenate(
        [jnp.broadcast_to(state[:, None, :], (B, N, Ds)), y], axis=-1
    ).reshape(B * N, Ds + Dy)
    return _ref_mlp(fused, q1_params), _ref_mlp(fused, q2_params)


if __name__ == "__main__":
    key = jax.random.PRNGKey(0)
    k_state, k_y, k_q1, k_q2, k_state2, k_y2 = jax.random.split(key, 6)

    B, N = 2, 8          # batch, number of action samples
    Ds, Dy = 16, 16      # state dim, action dim
    hidden = 32
    in_dim = Ds + Dy

    q1_params = make_q_params(k_q1, in_dim, hidden)
    q2_params = make_q_params(k_q2, in_dim, hidden)
    packed = pack_critic_params(q1_params, q2_params, ds=Ds)

    # --- Test 1: small batch, single full tile -------------------------------
    state = jax.random.normal(k_state, (B, Ds), jnp.float32)
    y = jax.random.normal(k_y, (B, N, Dy), jnp.float32)

    q1_out, q2_out = critic_mlp_forward(state, y, packed)
    jax.block_until_ready((q1_out, q2_out))

    ref1, ref2 = _ref_critic(state, y, q1_params, q2_params)
    assert q1_out.shape == (B * N, 1) and q2_out.shape == (B * N, 1)
    # bf16 MXU operands (f32 accumulation) -> looser tolerance vs f32 reference.
    assert jnp.allclose(q1_out, ref1, atol=5e-2, rtol=5e-2)
    assert jnp.allclose(q2_out, ref2, atol=5e-2, rtol=5e-2)

    # --- Test 2: B not a multiple of tb -> 2 grid steps, masked edge tile ----
    B2 = 10
    state2 = jax.random.normal(k_state2, (B2, Ds), jnp.float32)
    y2 = jax.random.normal(k_y2, (B2, N, Dy), jnp.float32)

    q1b, q2b = critic_mlp_forward(state2, y2, packed, tb=8)
    jax.block_until_ready((q1b, q2b))

    ref1b, ref2b = _ref_critic(state2, y2, q1_params, q2_params)
    assert q1b.shape == (B2 * N, 1) and q2b.shape == (B2 * N, 1)
    assert jnp.allclose(q1b, ref1b, atol=5e-2, rtol=5e-2)
    assert jnp.allclose(q2b, ref2b, atol=5e-2, rtol=5e-2)

    print("KERNEL_OK")
</pallas_src>

<mosaic_0001>
module attributes {stable_mosaic.version = 11 : i64} {
  func.func @_critic_fused_kernel(%arg0: i32, %arg1: memref<2x16xf32, #tpu.memory_space<vmem>>, %arg2: memref<16x16xf32, #tpu.memory_space<vmem>>, %arg3: memref<16x128xbf16, #tpu.memory_space<vmem>>, %arg4: memref<16x128xbf16, #tpu.memory_space<vmem>>, %arg5: memref<1x128xf32, #tpu.memory_space<vmem>>, %arg6: memref<128x128xbf16, #tpu.memory_space<vmem>>, %arg7: memref<1x128xf32, #tpu.memory_space<vmem>>, %arg8: memref<128x2xbf16, #tpu.memory_space<vmem>>, %arg9: memref<1x2xf32, #tpu.memory_space<vmem>>, %arg10: memref<16x2xf32, #tpu.memory_space<vmem>>) attributes {dimension_semantics = [#tpu.dimension_semantics<parallel>], iteration_bounds = array<i64: 1>, scalar_prefetch = 0 : i64, scratch_operands = 0 : i64, tpu.core_type = #tpu.core_type<tc>, window_params = [{transform_indices = @transform_0, window_bounds = array<i64: 2, 16>}, {transform_indices = @transform_1, window_bounds = array<i64: 16, 16>}, {pipeline_mode = #tpu.pipeline_mode<synchronous>, transform_indices = @transform_2, window_bounds = array<i64: 16, 128>}, {pipeline_mode = #tpu.pipeline_mode<synchronous>, transform_indices = @transform_3, window_bounds = array<i64: 16, 128>}, {pipeline_mode = #tpu.pipeline_mode<synchronous>, transform_indices = @transform_4, window_bounds = array<i64: 1, 128>}, {pipeline_mode = #tpu.pipeline_mode<synchronous>, transform_indices = @transform_5, window_bounds = array<i64: 128, 128>}, {pipeline_mode = #tpu.pipeline_mode<synchronous>, transform_indices = @transform_6, window_bounds = array<i64: 1, 128>}, {pipeline_mode = #tpu.pipeline_mode<synchronous>, transform_indices = @transform_7, window_bounds = array<i64: 128, 2>}, {pipeline_mode = #tpu.pipeline_mode<synchronous>, transform_indices = @transform_8, window_bounds = array<i64: 1, 2>}, {transform_indices = @transform_9, window_bounds = array<i64: 16, 2>}]} {
    %c0 = arith.constant 0 : index
    %c0_0 = arith.constant 0 : index
    %0 = vector.load %arg1[%c0, %c0_0] : memref<2x16xf32, #tpu.memory_space<vmem>>, vector<2x16xf32>
    %1 = arith.truncf %0 : vector<2x16xf32> to vector<2x16xbf16>
    %c0_1 = arith.constant 0 : index
    %c0_2 = arith.constant 0 : index
    %2 = vector.load %arg3[%c0_1, %c0_2] : memref<16x128xbf16, #tpu.memory_space<vmem>>, vector<16x128xbf16>
    %cst = arith.constant dense<0.000000e+00> : vector<2x128xf32>
    %3 = tpu.matmul %1, %2, %cst {dimension_numbers = #tpu.dot_dimension_numbers<[1], [0], [0], [1], [0, 0, 1, 1], [], []>} : vector<2x16xbf16>, vector<16x128xbf16>, vector<2x128xf32> -> vector<2x128xf32>
    %c0_3 = arith.constant 0 : index
    %c0_4 = arith.constant 0 : index
    %4 = vector.load %arg5[%c0_3, %c0_4] : memref<1x128xf32, #tpu.memory_space<vmem>>, vector<1x128xf32>
    %5 = vector.broadcast %4 : vector<1x128xf32> to vector<2x128xf32>
    %6 = arith.addf %3, %5 : vector<2x128xf32>
    %c0_5 = arith.constant 0 : index
    %c0_6 = arith.constant 0 : index
    %7 = vector.load %arg2[%c0_5, %c0_6] : memref<16x16xf32, #tpu.memory_space<vmem>>, vector<16x16xf32>
    %8 = arith.truncf %7 : vector<16x16xf32> to vector<16x16xbf16>
    %c0_7 = arith.constant 0 : index
    %c0_8 = arith.constant 0 : index
    %9 = vector.load %arg4[%c0_7, %c0_8] : memref<16x128xbf16, #tpu.memory_space<vmem>>, vector<16x128xbf16>
    %cst_9 = arith.constant dense<0.000000e+00> : vector<16x128xf32>
    %10 = tpu.matmul %8, %9, %cst_9 {dimension_numbers = #tpu.dot_dimension_numbers<[1], [0], [0], [1], [0, 0, 1, 1], [], []>} : vector<16x16xbf16>, vector<16x128xbf16>, vector<16x128xf32> -> vector<16x128xf32>
    %11 = vector.shape_cast %10 : vector<16x128xf32> to vector<2x8x128xf32>
    %12 = vector.shape_cast %6 : vector<2x128xf32> to vector<2x1x128xf32>
    %13 = vector.broadcast %12 : vector<2x1x128xf32> to vector<2x8x128xf32>
    %14 = arith.addf %11, %13 : vector<2x8x128xf32>
    %15 = vector.shape_cast %14 : vector<2x8x128xf32> to vector<16x128xf32>
    %cst_10 = arith.constant 0.000000e+00 : f32
    %16 = vector.broadcast %cst_10 : f32 to vector<16x128xf32>
    %17 = arith.maximumf %15, %16 : vector<16x128xf32>
    %18 = arith.truncf %17 : vector<16x128xf32> to vector<16x128xbf16>
    %c0_11 = arith.constant 0 : index
    %c0_12 = arith.constant 0 : index
    %19 = vector.load %arg6[%c0_11, %c0_12] : memref<128x128xbf16, #tpu.memory_space<vmem>>, vector<128x128xbf16>
    %cst_13 = arith.constant dense<0.000000e+00> : vector<16x128xf32>
    %20 = tpu.matmul %18, %19, %cst_13 {dimension_numbers = #tpu.dot_dimension_numbers<[1], [0], [0], [1], [0, 0, 1, 1], [], []>} : vector<16x128xbf16>, vector<128x128xbf16>, vector<16x128xf32> -> vector<16x128xf32>
    %c0_14 = arith.constant 0 : index
    %c0_15 = arith.constant 0 : index
    %21 = vector.load %arg7[%c0_14, %c0_15] : memref<1x128xf32, #tpu.memory_space<vmem>>, vector<1x128xf32>
    %22 = vector.broadcast %21 : vector<1x128xf32> to vector<16x128xf32>
    %23 = arith.addf %20, %22 : vector<16x128xf32>
    %cst_16 = arith.constant 0.000000e+00 : f32
    %24 = vector.broadcast %cst_16 : f32 to vector<16x128xf32>
    %25 = arith.maximumf %23, %24 : vector<16x128xf32>
    %26 = arith.truncf %25 : vector<16x128xf32> to vector<16x128xbf16>
    %c0_17 = arith.constant 0 : index
    %c0_18 = arith.constant 0 : index
    %27 = vector.load %arg8[%c0_17, %c0_18] : memref<128x2xbf16, #tpu.memory_space<vmem>>, vector<128x2xbf16>
    %cst_19 = arith.constant dense<0.000000e+00> : vector<16x2xf32>
    %28 = tpu.matmul %26, %27, %cst_19 {dimension_numbers = #tpu.dot_dimension_numbers<[1], [0], [0], [1], [0, 0, 1, 1], [], []>} : vector<16x128xbf16>, vector<128x2xbf16>, vector<16x2xf32> -> vector<16x2xf32>
    %c0_20 = arith.constant 0 : index
    %c0_21 = arith.constant 0 : index
    %29 = vector.load %arg9[%c0_20, %c0_21] : memref<1x2xf32, #tpu.memory_space<vmem>>, vector<1x2xf32>
    %30 = vector.broadcast %29 : vector<1x2xf32> to vector<16x2xf32>
    %31 = arith.addf %28, %30 : vector<16x2xf32>
    %c0_22 = arith.constant 0 : index
    %c0_23 = arith.constant 0 : index
    %32 = vector.load %arg10[%c0_22, %c0_23] : memref<16x2xf32, #tpu.memory_space<vmem>>, vector<16x2xf32>
    tpu.vector_store %arg10[%c0_22, %c0_23], %31 {strides = array<i32>} : memref<16x2xf32, #tpu.memory_space<vmem>>, vector<16x2xf32>,
    return
  }
  func.func @transform_0(%arg0: i32) -> (i32, i32) {
    %c0_i32 = arith.constant 0 : i32
    %c0_i32_0 = arith.constant 0 : i32
    return %arg0, %c0_i32 : i32, i32
  }
  func.func @transform_1(%arg0: i32) -> (i32, i32) {
    %c0_i32 = arith.constant 0 : i32
    %c0_i32_0 = arith.constant 0 : i32
    return %arg0, %c0_i32 : i32, i32
  }
  func.func @transform_2(%arg0: i32) -> (i32, i32) {
    %c0_i32 = arith.constant 0 : i32
    %c0_i32_0 = arith.constant 0 : i32
    %c0_i32_1 = arith.constant 0 : i32
    return %c0_i32, %c0_i32_0 : i32, i32
  }
  func.func @transform_3(%arg0: i32) -> (i32, i32) {
    %c0_i32 = arith.constant 0 : i32
    %c0_i32_0 = arith.constant 0 : i32
    %c0_i32_1 = arith.constant 0 : i32
    return %c0_i32, %c0_i32_0 : i32, i32
  }
  func.func @transform_4(%arg0: i32) -> (i32, i32) {
    %c0_i32 = arith.constant 0 : i32
    %c0_i32_0 = arith.constant 0 : i32
    %c0_i32_1 = arith.constant 0 : i32
    return %c0_i32, %c0_i32_0 : i32, i32
  }
  func.func @transform_5(%arg0: i32) -> (i32, i32) {
    %c0_i32 = arith.constant 0 : i32
    %c0_i32_0 = arith.constant 0 : i32
    %c0_i32_1 = arith.constant 0 : i32
    return %c0_i32, %c0_i32_0 : i32, i32
  }
  func.func @transform_6(%arg0: i32) -> (i32, i32) {
    %c0_i32 = arith.constant 0 : i32
    %c0_i32_0 = arith.constant 0 : i32
    %c0_i32_1 = arith.constant 0 : i32
    return %c0_i32, %c0_i32_0 : i32, i32
  }
  func.func @transform_7(%arg0: i32) -> (i32, i32) {
    %c0_i32 = arith.constant 0 : i32
    %c0_i32_0 = arith.constant 0 : i32
    %c0_i32_1 = arith.constant 0 : i32
    return %c0_i32, %c0_i32_0 : i32, i32
  }
  func.func @transform_8(%arg0: i32) -> (i32, i32) {
    %c0_i32 = arith.constant 0 : i32
    %c0_i32_0 = arith.constant 0 : i32
    %c0_i32_1 = arith.constant 0 : i32
    return %c0_i32, %c0_i32_0 : i32, i32
  }
  func.func @transform_9(%arg0: i32) -> (i32, i32) {
    %c0_i32 = arith.constant 0 : i32
    %c0_i32_0 = arith.constant 0 : i32
    return %arg0, %c0_i32 : i32, i32
  }
}

</mosaic_0001>

<bundles_post_ra>
// kernel: tpu_custom_call.1
= control target key start
LH: loop header
LB: loop body
LE: loop exit
PB: predicated region body
PF: predicated region fallthrough
CT: control target
= control target key end

     0   :  { %14 = vsyncpa [#allocation3], 0  ;;  %s800_s0 = inlined_call_operand.vmem [shape: f32[2,16], index: 0, kind: input, shape index: {}]   ;;  %s801_s1 = inlined_call_operand.vmem [shape: f32[16,16], index: 1, kind: input, shape index: {}]   ;;  %s802_s2 = inlined_call_operand.hbm [shape: bf16[16,128], index: 2, kind: input, shape index: {}]   ;;  %s803_s3 = inlined_call_operand.hbm [shape: bf16[16,128], index: 3, kind: input, shape index: {}]   ;;  %s804_s4 = inlined_call_operand.vmem [shape: f32[1,128], index: 4, kind: input, shape index: {}]   ;;  %s805_s5 = inlined_call_operand.vmem [shape: bf16[128,128], index: 5, kind: input, shape index: {}]   ;;  %s806_s6 = inlined_call_operand.vmem [shape: f32[1,128], index: 6, kind: input, shape index: {}]   ;;  %s807_s7 = inlined_call_operand.vmem [shape: bf16[128,2], index: 7, kind: input, shape index: {}]   ;;  %s808_s8 = inlined_call_operand.vmem [shape: f32[1,2], index: 8, kind: input, shape index: {}]   ;;  %s809_s9 = inlined_call_operand.vmem [shape: f32[16,2], index: 9, kind: output, shape index: {}]  }
   0x1   :  { %15 = vsyncpa [#allocation5], 0  ;;  %s621_s30 = smov [#allocation2]   ;;  %s573_s13 = scalar_lea.hbm %s802_s2, 128 }
   0x2   :  { %s25_s10 = sshll.u32 %s621_s30, 4  ;;  %p574_p0 = scmp.ne.s32.totalorder %s802_s2, %s573_s13  ;;  %s26_s10 = int_to_ptr.vmem [resolvable:$true] %s25_s10 }
   0x3   :  { %p577_p1 = scmp.lt.u32.totalorder %s573_s13, %s802_s2 }
   0x5   :  { %p579_p2 = pnand %p577_p1, %p574_p0 }
   0x7   :  { %582 = shalt.err (!%p579_p2)
}
   0x8   :  { %s583_s18 = scalar_lea.vmem %s26_s10, 128  ;;  %p588_p4 = scmp.lt.s32.totalorder %s26_s10, %s26_s10 }
   0x9   :  { %p584_p3 = scmp.ne.s32.totalorder %s26_s10, %s583_s18  ;;  %p589_p5 = scmp.lt.s32.totalorder %s583_s18, %s583_s18 }
   0xb   :  { %p590_p6 = por %p589_p5, %p588_p4 }
   0xd   :  { %p591_p7 = pnand %p590_p6, %p584_p3 }
   0xf   :  { %594 = shalt.err (!%p591_p7)
}
  0x10   :  { %s622_s19 = smov 64   ;;  %s623_s20 = smov 4  }
  0x11   :  { %31 = dma.hbm_to_vmem [thread:$0]  %s802_s2, 128, %s26_s10, [#allocation3], %s622_s19, %s622_s19, %s623_s20  }
  0x12   :  { %s624_s23 = smov [#allocation4]   ;;  %s595_s27 = scalar_lea.hbm %s803_s3, 128 }
  0x13   :  { %s37_s24 = sshll.u32 %s624_s23, 4  ;;  %p596_p8 = scmp.ne.s32.totalorder %s803_s3, %s595_s27  ;;  %s38_s24 = int_to_ptr.vmem [resolvable:$true] %s37_s24 }
  0x14   :  { %p599_p9 = scmp.lt.u32.totalorder %s595_s27, %s803_s3 }
  0x16   :  { %p601_p10 = pnand %p599_p9, %p596_p8 }
  0x18   :  { %604 = shalt.err (!%p601_p10)
}
  0x19   :  { %s605_s12 = scalar_lea.vmem %s38_s24, 128  ;;  %p610_p12 = scmp.lt.s32.totalorder %s38_s24, %s38_s24 }
  0x1a   :  { %p606_p11 = scmp.ne.s32.totalorder %s38_s24, %s605_s12  ;;  %p611_p13 = scmp.lt.s32.totalorder %s605_s12, %s605_s12 }
  0x1c   :  { %p612_p0 = por %p611_p13, %p610_p12 }
  0x1e   :  { %p613_p1 = pnand %p612_p0, %p606_p11 }
  0x20   :  { %616 = shalt.err (!%p613_p1)
}
  0x21   :  { %43 = dma.hbm_to_vmem [thread:$0]  %s803_s3, 128, %s38_s24, [#allocation5], %s622_s19, %s622_s19, %s623_s20  }
  0x22   :  { %617 = dma.done.wait [#allocation3], 128  }
  0x23   :  { %618 = vsyncadd [#allocation3], 4294967168 }
  0x24   :  { %619 = dma.done.wait [#allocation5], 128  }
  0x25   :  { %620 = vsyncadd [#allocation5], 4294967168  ;;  %v625_v0 = vmov 0.0   ;;  %vm626_vm0 = vmmov 0   ;;  %v555_v1 = vld [vmem:[#allocation2] sm:$0xff]   ;;  %vm78_vm1 = vcmask 130048   ;;  %v181_v24 = vlaneseq }
  0x26   :  { %496 = vmatprep.subr.bf16.mxu0 %v625_v0  ;;  %498 = vmatprep.mubr.msk.bf16.mxu0 %vm626_vm0, %v625_v0  ;;  %v61_v2 = vld [vmem:[%s800_s0] sm:$0x3]  ;;  %v556_v4 = vld [vmem:[#allocation4] sm:$0xff]   ;;  %v559_v10 = vld [vmem:[%s805_s5 + $0x10] sm:$0xff]   ;;  %v627_v22 = vmov 1966171168  }
  0x27   :  { %502 = vmatprep.subr.bf16.mxu1 %v625_v0  ;;  %504 = vmatprep.mubr.msk.bf16.mxu1 %vm626_vm0, %v625_v0  ;;  %v62_v3 = vpack.c.bf16 %v61_v2, %v61_v2  ;;  %v122_v5 = vld [vmem:[%s801_s1] sm:$0xff]  ;;  %v123_v6 = vld [vmem:[%s801_s1 + $0x8] sm:$0xff]  ;;  %v560_v11 = vld [vmem:[%s805_s5 + $0x18] sm:$0xff]   ;;  %v179_v23 = vunpack.c.l.s4 %v627_v22  ;;  %v182_v26 = vshrl.u32 %v181_v24, 7  ;;  %vm442_vm2 = vcmask 15360  }
  0x28   :  { %497 = vmatpush3.bf16.msra.mxu0 %v555_v1  ;;  %v124_v7 = vpack.c.bf16 %v123_v6, %v122_v5  ;;  %v557_v8 = vld [vmem:[%s805_s5] sm:$0xff]   ;;  %503 = vmatpush3.bf16.msra.mxu1 %v556_v4  ;;  %v558_v9 = vld [vmem:[%s805_s5 + $0x8] sm:$0xff]   ;;  %v563_v14 = vld [vmem:[%s805_s5 + $0x30] sm:$0xff]  }
  0x29   :  { %508 = vmatprep.subr.bf16.mxu0 %v625_v0  ;;  %528 = vmatprep.subr.bf16.mxu1 %v625_v0  ;;  %v561_v12 = vld [vmem:[%s805_s5 + $0x20] sm:$0xff]   ;;  %v562_v13 = vld [vmem:[%s805_s5 + $0x28] sm:$0xff]   ;;  %v564_v15 = vld [vmem:[%s805_s5 + $0x38] sm:$0xff]   ;;  %v180_v25 = vunpack.c.0.s8 %v179_v23  ;;  %v202_v36 = vsub.s32 0, %v182_v26 }
  0x2a   :  { %v565_v16 = vld [vmem:[%s807_s7] sm:$0xff]   ;;  %v566_v17 = vld [vmem:[%s807_s7 + $0x8] sm:$0xff]   ;;  %v567_v18 = vld [vmem:[%s807_s7 + $0x10] sm:$0xff]  }
  0x2b   :  { %499 = vmatmul.mubr.msk.bf16.vlgmr.msra.gmra.mrb[0].mxu0 %vm78_vm1, %v62_v3  ;;  %505 = vmatmul.mubr.msk.bf16.vlgmr.msra.gmra.mrb[0].mxu1 %vm78_vm1, %v124_v7  ;;  %v568_v19 = vld [vmem:[%s807_s7 + $0x18] sm:$0xff]   ;;  %v569_v20 = vld [vmem:[%s807_s7 + $0x20] sm:$0xff]   ;;  %v570_v21 = vld [vmem:[%s807_s7 + $0x28] sm:$0xff]   ;;  %v183_v28 = vsub.s32 %v180_v25, %v182_v26 }
  0x2c   :  { %509 = vmatpush3.bf16.msra.mxu0 %v557_v8  ;;  %524 = vmatprep.mubr.msk.bf16.mxu0 %vm626_vm0, %v625_v0  ;;  %v451_v27 = vld [vmem:[%s804_s4] ss:$0 sm:$0xff]  ;;  %v571_v50 = vld [vmem:[%s807_s7 + $0x30] sm:$0xff]   ;;  %v572_v51 = vld [vmem:[%s807_s7 + $0x38] sm:$0xff]  }
  0x2d   :  { %510 = vmatprep.subr.bf16.mxu0 %v625_v0  ;;  %544 = vmatprep.mubr.msk.bf16.mxu1 %vm626_vm0, %v625_v0  ;;  %v456_v52 = vld [vmem:[%s806_s6] ss:$0 sm:$0xff] }
  0x2e   :  { %529 = vmatpush3.bf16.msra.mxu1 %v565_v16  ;;  %v465_v62 = vld [vmem:[%s808_s8] ss:$0 sm:$0xff] }
  0x2f   :  { %530 = vmatprep.subr.bf16.mxu1 %v625_v0 }
  0x30   :  { %511 = vmatpush3.bf16.msra.mxu0 %v558_v9 }
  0x31   :  { %512 = vmatprep.subr.bf16.mxu0 %v625_v0 }
  0x32   :  { %531 = vmatpush3.bf16.msra.mxu1 %v566_v17 }
  0x33   :  { %532 = vmatprep.subr.bf16.mxu1 %v625_v0 }
  0x34   :  { %513 = vmatpush3.bf16.msra.mxu0 %v559_v10 }
  0x35   :  { %514 = vmatprep.subr.bf16.mxu0 %v625_v0 }
  0x36   :  { %533 = vmatpush3.bf16.msra.mxu1 %v567_v18 }
  0x37   :  { %534 = vmatprep.subr.bf16.mxu1 %v625_v0 }
  0x38   :  { %515 = vmatpush3.bf16.msra.mxu0 %v560_v11 }
  0x39   :  { %516 = vmatprep.subr.bf16.mxu0 %v625_v0 }
  0x3a   :  { %535 = vmatpush3.bf16.msra.mxu1 %v568_v19 }
  0x3b   :  { %536 = vmatprep.subr.bf16.mxu1 %v625_v0 }
  0x3c   :  { %517 = vmatpush3.bf16.msra.mxu0 %v561_v12 }
  0x3d   :  { %518 = vmatprep.subr.bf16.mxu0 %v625_v0 }
  0x3e   :  { %537 = vmatpush3.bf16.msra.mxu1 %v569_v20 }
  0x3f   :  { %538 = vmatprep.subr.bf16.mxu1 %v625_v0 }
  0x40   :  { %519 = vmatpush3.bf16.msra.mxu0 %v562_v13 }
  0x41   :  { %520 = vmatprep.subr.bf16.mxu0 %v625_v0 }
  0x42   :  { %539 = vmatpush3.bf16.msra.mxu1 %v570_v21 }
  0x43   :  { %540 = vmatprep.subr.bf16.mxu1 %v625_v0 }
  0x44   :  { %521 = vmatpush3.bf16.msra.mxu0 %v563_v14 }
  0x45   :  { %522 = vmatprep.subr.bf16.mxu0 %v625_v0 }
  0x46   :  { %541 = vmatpush3.bf16.msra.mxu1 %v571_v50 }
  0x47   :  { %542 = vmatprep.subr.bf16.mxu1 %v625_v0 }
  0x48   :  { %523 = vmatpush3.bf16.msra.mxu0 %v564_v15 }
  0x4a   :  { %543 = vmatpush3.bf16.msra.mxu1 %v572_v51 }
  0xfe   :  { %v116_v29 = vpop.f32.mrb[0].mxu0  ;;  %v170_v33 = vpop.f32.mrb[0].mxu1 }
  0xff   :  { %v117_v30 = vadd.f32 %v451_v27, %v116_v29  ;;  %v500_v31 = vpop.f32.mrb[1].mxu0  ;;  %v506_v37 = vpop.f32.mrb[1].mxu1 }
 0x100   :  { %v119_v32 = vpop.f32.mrb[2].mxu0  ;;  %v173_v38 = vpop.f32.mrb[2].mxu1 }
 0x101   :  { %v184_v34 = vrot.slane %v117_v30, %v183_v28  ;;  %v501_v35 = vpop.f32.mrb[3].mxu0  ;;  %v507_v41 = vpop.f32.mrb[3].mxu1 }
 0x103   :  { %v185_v39 = vcombine.high %v184_v34, %v184_v34  ;;  %v192_v40 = vrot.slane %v184_v34, %v183_v28 }
 0x105   :  { %v203_v42 = vrot.slane %v192_v40, %v202_v36  ;;  %v199_v43 = vrot.slane %v185_v39, %v183_v28 }
 0x107   :  { %v210_v44 = vadd.f32 %v203_v42, %v170_v33  ;;  %v207_v45 = vrot.slane %v199_v43, %v202_v36 }
 0x109   :  { %v211_v46 = vadd.f32 %v207_v45, %v173_v38  ;;  %v212_v47 = vmax.f32 %v210_v44, 0.0 }
 0x10b   :  { %v213_v48 = vmax.f32 %v211_v46, 0.0 }
 0x10d   :  { %v214_v49 = vpack.c.bf16 %v213_v48, %v212_v47 }
 0x10f   :  { %525 = vmatmul.mubr.bf16.vlgmr.msra.gmra.mrb[4].mxu0 %v214_v49 }
 0x1e2   :  { %v320_v53 = vpop.f32.mrb[4].mxu0 }
 0x1e3   :  { %v321_v54 = vadd.f32 %v456_v52, %v320_v53  ;;  %v526_v55 = vpop.f32.mrb[5].mxu0 }
 0x1e4   :  { %v323_v56 = vpop.f32.mrb[6].mxu0 }
 0x1e5   :  { %v324_v57 = vadd.f32 %v456_v52, %v323_v56  ;;  %v527_v58 = vpop.f32.mrb[7].mxu0  ;;  %v327_v59 = vmax.f32 %v321_v54, 0.0 }
 0x1e7   :  { %v328_v60 = vmax.f32 %v324_v57, 0.0 }
 0x1e9   :  { %v329_v61 = vpack.c.bf16 %v328_v60, %v327_v59 }
 0x1eb   :  { %545 = vmatmul.mubr.bf16.vlgmr.msra.gmra.mrb[4].mxu1 %v329_v61 }
 0x2be   :  { %v435_v63 = vpop.f32.mrb[4].mxu1 }
 0x2bf   :  { %v436_v0 = vadd.f32 %v465_v62, %v435_v63  ;;  %v546_v1 = vpop.f32.mrb[5].mxu1 }
 0x2c0   :  { %v438_v2 = vpop.f32.mrb[6].mxu1 }
 0x2c1   :  { %443 = vst.msk [vmem:[%s809_s9] sm:$0xff] %vm442_vm2, %v436_v0  ;;  %v439_v3 = vadd.f32 %v465_v62, %v438_v2  ;;  %v547_v4 = vpop.f32.mrb[7].mxu1 }
 0x2c3   :  { %444 = vst.msk [vmem:[%s809_s9 + $0x8] sm:$0xff] %vm442_vm2, %v439_v3 }
 0x2c4   :  { %449 = vsyncpa [#allocation3], 1 }
 0x2c5   :  { %450 = vsyncpa [#allocation5], 1 }

</bundles_post_ra>
